<compile_context>
chip_gen: v7x
topology: tpu7x:2x2x1
jax: 0.10.0
libtpu: 0.0.40
codegen_flags: <defaults>
</compile_context>

<pallas_src>
import functools
import math

import jax
import jax.numpy as jnp
import numpy as np
from jax import lax
from jax.experimental import pallas as pl
from jax.experimental.pallas import tpu as pltpu

# Small, module-consistent sizes.
D_MODEL = 32
NHEAD = 4
DFF = 64
HEAD_DIM = D_MODEL // NHEAD


def rztx_kernel(n_batch,
                q_ref, s_ref,
                wq_ref, bq_ref,          # query in-proj (scale pre-folded)
                wkv_ref, bkv_ref,        # packed key/value in-proj: (D, 2D)
                wo_ref,                  # output projection (D, D)
                w1_ref, w2_ref,          # FFN weights
                bmisc_ref,               # packed [bo | b1 | b2] -> (1, D+DFF+D)
                resw_ref,                # resweight scalar in SMEM, shape (1,)
                out_ref):
    """Whole-batch fused MHA + ReZero residual + FFN.  All activations are 2-D
    row matrices (rows ordered (l, n)); per-batch attention is enforced by a
    block-diagonal mask so no activation reshapes / relayouts are needed."""
    m_q, d = q_ref.shape            # m_q = L * N
    m_s = s_ref.shape[0]            # m_s = S * N  (== m_q, asserted in wrapper)
    dff = w1_ref.shape[1]

    resw = resw_ref[0]              # SMEM scalar

    bmisc = bmisc_ref[...]          # (1, D + DFF + D)
    bo = bmisc[:, :d]
    b1 = bmisc[:, d:d + dff]
    b2 = bmisc[:, d + dff:]

    # ---- fused in-projections over all rows (M = L*N / S*N) ----
    q = jnp.dot(q_ref[...], wq_ref[...], preferred_element_type=jnp.float32) + bq_ref[...]
    kv = jnp.dot(s_ref[...], wkv_ref[...], preferred_element_type=jnp.float32) + bkv_ref[...]
    k = kv[:, :d]
    v = kv[:, d:]

    # ---- block-diagonal mask keeps attention within each batch element ----
    # row = l * N + n_q, col = s * N + n_k  ->  valid iff n_q == n_k.
    if n_batch > 1:
        ri = lax.broadcasted_iota(jnp.int32, (m_q, m_s), 0)
        ci = lax.broadcasted_iota(jnp.int32, (m_q, m_s), 1)
        same_batch = (ri % n_batch) == (ci % n_batch)
    neg_big = jnp.float32(-1e30)

    # ---- attention: static head loop, output projection folded per head ----
    acc = jnp.zeros((m_q, d), jnp.float32)
    for h in range(NHEAD):
        lo = h * HEAD_DIM
        hi = lo + HEAD_DIM
        # scores = q_h @ k_h^T   (contract last dims; scale already folded into wq)
        sc = lax.dot_general(q[:, lo:hi], k[:, lo:hi],
                             (((1,), (1,)), ((), ())),
                             preferred_element_type=jnp.float32)        # (m_q, m_s)
        if n_batch > 1:
            sc = jnp.where(same_batch, sc, neg_big)
        sc = sc - jnp.max(sc, axis=-1, keepdims=True)
        p = jnp.exp(sc)
        p = p * pl.reciprocal(jnp.sum(p, axis=-1, keepdims=True), approx=True)
        ho = jnp.dot(p, v[:, lo:hi], preferred_element_type=jnp.float32)  # (m_q, hd)
        acc = acc + jnp.dot(ho, wo_ref[lo:hi, :],
                            preferred_element_type=jnp.float32)          # (m_q, d)

    # ---- ReZero residual 1 (requires S == L, kdim == vdim == d_model) ----
    att_out = s_ref[...] + (acc + bo) * resw

    # ---- feed-forward (fused over all rows): linear2(relu(linear1(x))) ----
    h1 = jnp.maximum(jnp.dot(att_out, w1_ref[...],
                             preferred_element_type=jnp.float32) + b1, 0.0)
    ff = jnp.dot(h1, w2_ref[...], preferred_element_type=jnp.float32) + b2

    # ---- ReZero residual 2 ----
    out_ref[...] = att_out + ff * resw


def pack_params(raw_params):
    """One-time parameter packing (outside the per-call path).

    raw params follow PyTorch layout but pre-transposed for y = x @ W + b."""
    (wq, wk, wv, bq, bk, bv, wo, bo, w1, b1, w2, b2, resw) = raw_params
    scale = 1.0 / math.sqrt(HEAD_DIM)
    wq_s = wq * scale                                   # fold 1/sqrt(hd) into q proj
    bq_s = bq * scale
    wkv = jnp.concatenate([wk, wv], axis=1)             # (D, 2D)
    bkv = jnp.concatenate([bk, bv], axis=1)             # (1, 2D)
    bmisc = jnp.concatenate([bo, b1, b2], axis=1)       # (1, D + DFF + D) = (1, 128)
    resw_s = jnp.reshape(resw, (1,))                    # SMEM scalar
    return (wq_s, bq_s, wkv, bkv, wo, w1, w2, bmisc, resw_s)


def rztx_forward(query_lnd, src_snd, packed):
    """query_lnd: (L, N, D), src_snd: (S, N, D) (PyTorch seq-first).

    Returns the encoder-layer output with shape (L, N, D)."""
    (wq_s, bq_s, wkv, bkv, wo, w1, w2, bmisc, resw) = packed
    L, N, D = query_lnd.shape
    S, N2, D2 = src_snd.shape
    assert (N2, D2) == (N, D), "query/src must share batch and feature dims"
    assert S == L, ("ReZero residual adds `src` to the attention output; this "
                    "requires S == L (and kdim == vdim == d_model).")
    assert D == D_MODEL

    # Flatten seq-first (L, N, D) -> (L*N, D): contiguous leading-dim merge, a
    # free (bitcast) reshape in XLA -- no transpose, no HBM round trip.
    qf = query_lnd.reshape(L * N, D)
    sf = src_snd.reshape(S * N, D)

    vmem = pl.BlockSpec(memory_space=pltpu.MemorySpace.VMEM)
    smem = pl.BlockSpec(memory_space=pltpu.MemorySpace.SMEM)

    out_flat = pl.pallas_call(
        functools.partial(rztx_kernel, N),
        out_shape=jax.ShapeDtypeStruct((L * N, D), jnp.float32),
        in_specs=[vmem, vmem,                 # query rows, src rows
                  vmem, vmem,                 # wq_s, bq_s
                  vmem, vmem,                 # wkv, bkv
                  vmem,                       # wo
                  vmem, vmem,                 # w1, w2
                  vmem,                       # packed biases
                  smem],                      # resweight scalar
        out_specs=vmem,
    )(qf, sf, wq_s, bq_s, wkv, bkv, wo, w1, w2, bmisc, resw)

    return out_flat.reshape(L, N, D)          # free reshape back to seq-first


def ref_forward(query_lnd, src_snd, raw_params):
    """Pure-JAX reference of the PyTorch forward (eval mode), raw params."""
    (wq, wk, wv, bq, bk, bv, wo, bo, w1, b1, w2, b2, resw) = raw_params
    q_bf = jnp.transpose(query_lnd, (1, 0, 2))
    s_bf = jnp.transpose(src_snd, (1, 0, 2))
    N, L, D = q_bf.shape
    S = s_bf.shape[1]
    q = q_bf @ wq + bq
    k = s_bf @ wk + bk
    v = s_bf @ wv + bv
    qh = q.reshape(N, L, NHEAD, HEAD_DIM).transpose(0, 2, 1, 3)
    kh = k.reshape(N, S, NHEAD, HEAD_DIM).transpose(0, 2, 1, 3)
    vh = v.reshape(N, S, NHEAD, HEAD_DIM).transpose(0, 2, 1, 3)
    scores = jnp.einsum('nhld,nhsd->nhls', qh, kh) / math.sqrt(HEAD_DIM)
    p = jax.nn.softmax(scores, axis=-1)
    o = jnp.einsum('nhls,nhsd->nhld', p, vh).transpose(0, 2, 1, 3).reshape(N, L, D)
    attn = o @ wo + bo
    r = resw[0, 0]
    att_out = s_bf + attn * r
    ff = jnp.maximum(att_out @ w1 + b1, 0.0) @ w2 + b2
    out = att_out + ff * r
    return jnp.transpose(out, (1, 0, 2))


if __name__ == "__main__":
    L = S = 8
    N = 2

    key = jax.random.PRNGKey(0)
    ks = jax.random.split(key, 12)
    wscale = 0.1

    query = jax.random.normal(ks[0], (L, N, D_MODEL), jnp.float32)
    src = jax.random.normal(ks[1], (S, N, D_MODEL), jnp.float32)

    # Deterministic parameter init (shapes follow MultiheadAttention / Linear in
    # __init__; weights stored transposed for y = x @ W + b).
    wq = jax.random.normal(ks[2], (D_MODEL, D_MODEL), jnp.float32) * wscale
    wk = jax.random.normal(ks[3], (D_MODEL, D_MODEL), jnp.float32) * wscale
    wv = jax.random.normal(ks[4], (D_MODEL, D_MODEL), jnp.float32) * wscale
    bq = jax.random.normal(ks[5], (1, D_MODEL), jnp.float32) * wscale
    bk = jax.random.normal(ks[6], (1, D_MODEL), jnp.float32) * wscale
    bv = jax.random.normal(ks[7], (1, D_MODEL), jnp.float32) * wscale
    wo = jax.random.normal(ks[8], (D_MODEL, D_MODEL), jnp.float32) * wscale
    bo = jnp.zeros((1, D_MODEL), jnp.float32)
    w1 = jax.random.normal(ks[9], (D_MODEL, DFF), jnp.float32) * wscale
    b1 = jax.random.normal(ks[10], (1, DFF), jnp.float32) * wscale
    w2 = jax.random.normal(ks[11], (DFF, D_MODEL), jnp.float32) * wscale
    b2 = jnp.zeros((1, D_MODEL), jnp.float32)
    # Module __init__ sets resweight = 0 (which makes output == src); use a nonzero
    # deterministic value so the ReZero path is actually exercised.
    resw = jnp.full((1, 1), 0.1, jnp.float32)

    raw_params = (wq, wk, wv, bq, bk, bv, wo, bo, w1, b1, w2, b2, resw)
    packed = pack_params(raw_params)      # one-time packing (scale fold, QKV/bias packing)

    out = rztx_forward(query, src, packed)
    jax.block_until_ready(out)

    ref = ref_forward(query, src, raw_params)
    # Tolerance loosened slightly (1e-4 -> 5e-4) to accommodate the approximate EUP
    # reciprocal used for the softmax normalization (per performance review note).
    np.testing.assert_allclose(np.asarray(out), np.asarray(ref), rtol=5e-4, atol=5e-4)

    print("KERNEL_OK")
</pallas_src>

<mosaic_0001>
module attributes {stable_mosaic.version = 11 : i64} {
  func.func @rztx_kernel(%arg0: memref<16x32xf32, #tpu.memory_space<vmem>>, %arg1: memref<16x32xf32, #tpu.memory_space<vmem>>, %arg2: memref<32x32xf32, #tpu.memory_space<vmem>>, %arg3: memref<1x32xf32, #tpu.memory_space<vmem>>, %arg4: memref<32x64xf32, #tpu.memory_space<vmem>>, %arg5: memref<1x64xf32, #tpu.memory_space<vmem>>, %arg6: memref<32x32xf32, #tpu.memory_space<vmem>>, %arg7: memref<32x64xf32, #tpu.memory_space<vmem>>, %arg8: memref<64x32xf32, #tpu.memory_space<vmem>>, %arg9: memref<1x128xf32, #tpu.memory_space<vmem>>, %arg10: memref<1xf32, #tpu.memory_space<smem>>, %arg11: memref<16x32xf32, #tpu.memory_space<vmem>>) attributes {dimension_semantics = [], scalar_prefetch = 0 : i64, scratch_operands = 0 : i64, tpu.core_type = #tpu.core_type<tc>} {
    %c0 = arith.constant 0 : index
    %0 = memref.load %arg10[%c0] : memref<1xf32, #tpu.memory_space<smem>>
    %c0_0 = arith.constant 0 : index
    %c0_1 = arith.constant 0 : index
    %1 = vector.load %arg9[%c0_0, %c0_1] : memref<1x128xf32, #tpu.memory_space<vmem>>, vector<1x128xf32>
    %2 = vector.extract_strided_slice %1 {offsets = [0, 0], sizes = [1, 32], strides = [1, 1]} : vector<1x128xf32> to vector<1x32xf32>
    %3 = vector.extract_strided_slice %1 {offsets = [0, 32], sizes = [1, 64], strides = [1, 1]} : vector<1x128xf32> to vector<1x64xf32>
    %4 = vector.extract_strided_slice %1 {offsets = [0, 96], sizes = [1, 32], strides = [1, 1]} : vector<1x128xf32> to vector<1x32xf32>
    %c0_2 = arith.constant 0 : index
    %c0_3 = arith.constant 0 : index
    %5 = vector.load %arg0[%c0_2, %c0_3] : memref<16x32xf32, #tpu.memory_space<vmem>>, vector<16x32xf32>
    %c0_4 = arith.constant 0 : index
    %c0_5 = arith.constant 0 : index
    %6 = vector.load %arg2[%c0_4, %c0_5] : memref<32x32xf32, #tpu.memory_space<vmem>>, vector<32x32xf32>
    %cst = arith.constant dense<0.000000e+00> : vector<16x32xf32>
    %7 = tpu.matmul %5, %6, %cst {dimension_numbers = #tpu.dot_dimension_numbers<[1], [0], [0], [1], [0, 0, 1, 1], [], []>} : vector<16x32xf32>, vector<32x32xf32>, vector<16x32xf32> -> vector<16x32xf32>
    %c0_6 = arith.constant 0 : index
    %c0_7 = arith.constant 0 : index
    %8 = vector.load %arg3[%c0_6, %c0_7] : memref<1x32xf32, #tpu.memory_space<vmem>>, vector<1x32xf32>
    %9 = vector.broadcast %8 : vector<1x32xf32> to vector<16x32xf32>
    %10 = arith.addf %7, %9 : vector<16x32xf32>
    %c0_8 = arith.constant 0 : index
    %c0_9 = arith.constant 0 : index
    %11 = vector.load %arg1[%c0_8, %c0_9] : memref<16x32xf32, #tpu.memory_space<vmem>>, vector<16x32xf32>
    %c0_10 = arith.constant 0 : index
    %c0_11 = arith.constant 0 : index
    %12 = vector.load %arg4[%c0_10, %c0_11] : memref<32x64xf32, #tpu.memory_space<vmem>>, vector<32x64xf32>
    %cst_12 = arith.constant dense<0.000000e+00> : vector<16x64xf32>
    %13 = tpu.matmul %11, %12, %cst_12 {dimension_numbers = #tpu.dot_dimension_numbers<[1], [0], [0], [1], [0, 0, 1, 1], [], []>} : vector<16x32xf32>, vector<32x64xf32>, vector<16x64xf32> -> vector<16x64xf32>
    %c0_13 = arith.constant 0 : index
    %c0_14 = arith.constant 0 : index
    %14 = vector.load %arg5[%c0_13, %c0_14] : memref<1x64xf32, #tpu.memory_space<vmem>>, vector<1x64xf32>
    %15 = vector.broadcast %14 : vector<1x64xf32> to vector<16x64xf32>
    %16 = arith.addf %13, %15 : vector<16x64xf32>
    %17 = vector.extract_strided_slice %16 {offsets = [0, 0], sizes = [16, 32], strides = [1, 1]} : vector<16x64xf32> to vector<16x32xf32>
    %18 = vector.extract_strided_slice %16 {offsets = [0, 32], sizes = [16, 32], strides = [1, 1]} : vector<16x64xf32> to vector<16x32xf32>
    %19 = tpu.iota {dimensions = array<i32: 0>} : vector<16x16xi32>
    %20 = tpu.iota {dimensions = array<i32: 1>} : vector<16x16xi32>
    %c2_i32 = arith.constant 2 : i32
    %c0_i32 = arith.constant 0 : i32
    %21 = arith.cmpi eq, %c2_i32, %c0_i32 : i32
    %c1_i32 = arith.constant 1 : i32
    %22 = arith.select %21, %c1_i32, %c2_i32 : i32
    %23 = vector.broadcast %22 : i32 to vector<16x16xi32>
    %24 = arith.remsi %19, %23 : vector<16x16xi32>
    %c0_i32_15 = arith.constant 0 : i32
    %25 = vector.broadcast %c0_i32_15 : i32 to vector<16x16xi32>
    %26 = arith.cmpi ne, %24, %25 : vector<16x16xi32>
    %c0_i32_16 = arith.constant 0 : i32
    %27 = vector.broadcast %c0_i32_16 : i32 to vector<16x16xi32>
    %28 = arith.cmpi slt, %24, %27 : vector<16x16xi32>
    %c0_i32_17 = arith.constant 0 : i32
    %29 = arith.cmpi slt, %22, %c0_i32_17 : i32
    %30 = vector.broadcast %29 : i1 to vector<16x16xi1>
    %31 = vector.broadcast %30 : vector<16x16xi1> to vector<16x16xi1>
    %32 = arith.xori %28, %31 : vector<16x16xi1>
    %33 = arith.andi %32, %26 : vector<16x16xi1>
    %34 = vector.broadcast %22 : i32 to vector<16x16xi32>
    %35 = arith.addi %24, %34 : vector<16x16xi32>
    %36 = arith.select %33, %35, %24 : vector<16x16xi1>, vector<16x16xi32>
    %c2_i32_18 = arith.constant 2 : i32
    %c0_i32_19 = arith.constant 0 : i32
    %37 = arith.cmpi eq, %c2_i32_18, %c0_i32_19 : i32
    %c1_i32_20 = arith.constant 1 : i32
    %38 = arith.select %37, %c1_i32_20, %c2_i32_18 : i32
    %39 = vector.broadcast %38 : i32 to vector<16x16xi32>
    %40 = arith.remsi %20, %39 : vector<16x16xi32>
    %c0_i32_21 = arith.constant 0 : i32
    %41 = vector.broadcast %c0_i32_21 : i32 to vector<16x16xi32>
    %42 = arith.cmpi ne, %40, %41 : vector<16x16xi32>
    %c0_i32_22 = arith.constant 0 : i32
    %43 = vector.broadcast %c0_i32_22 : i32 to vector<16x16xi32>
    %44 = arith.cmpi slt, %40, %43 : vector<16x16xi32>
    %c0_i32_23 = arith.constant 0 : i32
    %45 = arith.cmpi slt, %38, %c0_i32_23 : i32
    %46 = vector.broadcast %45 : i1 to vector<16x16xi1>
    %47 = vector.broadcast %46 : vector<16x16xi1> to vector<16x16xi1>
    %48 = arith.xori %44, %47 : vector<16x16xi1>
    %49 = arith.andi %48, %42 : vector<16x16xi1>
    %50 = vector.broadcast %38 : i32 to vector<16x16xi32>
    %51 = arith.addi %40, %50 : vector<16x16xi32>
    %52 = arith.select %49, %51, %40 : vector<16x16xi1>, vector<16x16xi32>
    %53 = arith.cmpi eq, %36, %52 : vector<16x16xi32>
    %cst_24 = arith.constant 0.000000e+00 : f32
    %54 = vector.broadcast %cst_24 : f32 to vector<16x32xf32>
    %55 = vector.extract_strided_slice %10 {offsets = [0, 0], sizes = [16, 8], strides = [1, 1]} : vector<16x32xf32> to vector<16x8xf32>
    %56 = vector.extract_strided_slice %17 {offsets = [0, 0], sizes = [16, 8], strides = [1, 1]} : vector<16x32xf32> to vector<16x8xf32>
    %cst_25 = arith.constant dense<0.000000e+00> : vector<16x16xf32>
    %57 = tpu.matmul %55, %56, %cst_25 {dimension_numbers = #tpu.dot_dimension_numbers<[1], [1], [0], [0], [0, 0, 1, 0], [], []>} : vector<16x8xf32>, vector<16x8xf32>, vector<16x16xf32> -> vector<16x16xf32>
    %cst_26 = arith.constant -1.000000e+30 : f32
    %58 = vector.broadcast %cst_26 : f32 to vector<16x16xf32>
    %59 = arith.select %53, %57, %58 : vector<16x16xi1>, vector<16x16xf32>
    %cst_27 = arith.constant dense<0xFF800000> : vector<16xf32>
    %60 = vector.multi_reduction <maximumf>, %59, %cst_27 [1] : vector<16x16xf32> to vector<16xf32>
    %61 = vector.shape_cast %60 : vector<16xf32> to vector<16x1xf32>
    %62 = vector.broadcast %61 : vector<16x1xf32> to vector<16x16xf32>
    %63 = arith.subf %59, %62 : vector<16x16xf32>
    %64 = math.exp %63 : vector<16x16xf32>
    %cst_28 = arith.constant dense<0.000000e+00> : vector<16xf32>
    %65 = vector.multi_reduction <add>, %64, %cst_28 [1] : vector<16x16xf32> to vector<16xf32>
    %66 = vector.shape_cast %65 : vector<16xf32> to vector<16x1xf32>
    %67 = tpu.reciprocal %66 {approx = true} : vector<16x1xf32> -> vector<16x1xf32>
    %68 = vector.broadcast %67 : vector<16x1xf32> to vector<16x16xf32>
    %69 = arith.mulf %64, %68 : vector<16x16xf32>
    %70 = vector.extract_strided_slice %18 {offsets = [0, 0], sizes = [16, 8], strides = [1, 1]} : vector<16x32xf32> to vector<16x8xf32>
    %cst_29 = arith.constant dense<0.000000e+00> : vector<16x8xf32>
    %71 = tpu.matmul %69, %70, %cst_29 {dimension_numbers = #tpu.dot_dimension_numbers<[1], [0], [0], [1], [0, 0, 1, 1], [], []>} : vector<16x16xf32>, vector<16x8xf32>, vector<16x8xf32> -> vector<16x8xf32>
    %c0_30 = arith.constant 0 : index
    %c0_31 = arith.constant 0 : index
    %72 = vector.load %arg6[%c0_30, %c0_31] : memref<32x32xf32, #tpu.memory_space<vmem>>, vector<8x32xf32>
    %cst_32 = arith.constant dense<0.000000e+00> : vector<16x32xf32>
    %73 = tpu.matmul %71, %72, %cst_32 {dimension_numbers = #tpu.dot_dimension_numbers<[1], [0], [0], [1], [0, 0, 1, 1], [], []>} : vector<16x8xf32>, vector<8x32xf32>, vector<16x32xf32> -> vector<16x32xf32>
    %74 = arith.addf %54, %73 : vector<16x32xf32>
    %75 = vector.extract_strided_slice %10 {offsets = [0, 8], sizes = [16, 8], strides = [1, 1]} : vector<16x32xf32> to vector<16x8xf32>
    %76 = vector.extract_strided_slice %17 {offsets = [0, 8], sizes = [16, 8], strides = [1, 1]} : vector<16x32xf32> to vector<16x8xf32>
    %cst_33 = arith.constant dense<0.000000e+00> : vector<16x16xf32>
    %77 = tpu.matmul %75, %76, %cst_33 {dimension_numbers = #tpu.dot_dimension_numbers<[1], [1], [0], [0], [0, 0, 1, 0], [], []>} : vector<16x8xf32>, vector<16x8xf32>, vector<16x16xf32> -> vector<16x16xf32>
    %cst_34 = arith.constant -1.000000e+30 : f32
    %78 = vector.broadcast %cst_34 : f32 to vector<16x16xf32>
    %79 = arith.select %53, %77, %78 : vector<16x16xi1>, vector<16x16xf32>
    %cst_35 = arith.constant dense<0xFF800000> : vector<16xf32>
    %80 = vector.multi_reduction <maximumf>, %79, %cst_35 [1] : vector<16x16xf32> to vector<16xf32>
    %81 = vector.shape_cast %80 : vector<16xf32> to vector<16x1xf32>
    %82 = vector.broadcast %81 : vector<16x1xf32> to vector<16x16xf32>
    %83 = arith.subf %79, %82 : vector<16x16xf32>
    %84 = math.exp %83 : vector<16x16xf32>
    %cst_36 = arith.constant dense<0.000000e+00> : vector<16xf32>
    %85 = vector.multi_reduction <add>, %84, %cst_36 [1] : vector<16x16xf32> to vector<16xf32>
    %86 = vector.shape_cast %85 : vector<16xf32> to vector<16x1xf32>
    %87 = tpu.reciprocal %86 {approx = true} : vector<16x1xf32> -> vector<16x1xf32>
    %88 = vector.broadcast %87 : vector<16x1xf32> to vector<16x16xf32>
    %89 = arith.mulf %84, %88 : vector<16x16xf32>
    %90 = vector.extract_strided_slice %18 {offsets = [0, 8], sizes = [16, 8], strides = [1, 1]} : vector<16x32xf32> to vector<16x8xf32>
    %cst_37 = arith.constant dense<0.000000e+00> : vector<16x8xf32>
    %91 = tpu.matmul %89, %90, %cst_37 {dimension_numbers = #tpu.dot_dimension_numbers<[1], [0], [0], [1], [0, 0, 1, 1], [], []>} : vector<16x16xf32>, vector<16x8xf32>, vector<16x8xf32> -> vector<16x8xf32>
    %c8 = arith.constant 8 : index
    %c0_38 = arith.constant 0 : index
    %92 = vector.load %arg6[%c8, %c0_38] : memref<32x32xf32, #tpu.memory_space<vmem>>, vector<8x32xf32>
    %cst_39 = arith.constant dense<0.000000e+00> : vector<16x32xf32>
    %93 = tpu.matmul %91, %92, %cst_39 {dimension_numbers = #tpu.dot_dimension_numbers<[1], [0], [0], [1], [0, 0, 1, 1], [], []>} : vector<16x8xf32>, vector<8x32xf32>, vector<16x32xf32> -> vector<16x32xf32>
    %94 = arith.addf %74, %93 : vector<16x32xf32>
    %95 = vector.extract_strided_slice %10 {offsets = [0, 16], sizes = [16, 8], strides = [1, 1]} : vector<16x32xf32> to vector<16x8xf32>
    %96 = vector.extract_strided_slice %17 {offsets = [0, 16], sizes = [16, 8], strides = [1, 1]} : vector<16x32xf32> to vector<16x8xf32>
    %cst_40 = arith.constant dense<0.000000e+00> : vector<16x16xf32>
    %97 = tpu.matmul %95, %96, %cst_40 {dimension_numbers = #tpu.dot_dimension_numbers<[1], [1], [0], [0], [0, 0, 1, 0], [], []>} : vector<16x8xf32>, vector<16x8xf32>, vector<16x16xf32> -> vector<16x16xf32>
    %cst_41 = arith.constant -1.000000e+30 : f32
    %98 = vector.broadcast %cst_41 : f32 to vector<16x16xf32>
    %99 = arith.select %53, %97, %98 : vector<16x16xi1>, vector<16x16xf32>
    %cst_42 = arith.constant dense<0xFF800000> : vector<16xf32>
    %100 = vector.multi_reduction <maximumf>, %99, %cst_42 [1] : vector<16x16xf32> to vector<16xf32>
    %101 = vector.shape_cast %100 : vector<16xf32> to vector<16x1xf32>
    %102 = vector.broadcast %101 : vector<16x1xf32> to vector<16x16xf32>
    %103 = arith.subf %99, %102 : vector<16x16xf32>
    %104 = math.exp %103 : vector<16x16xf32>
    %cst_43 = arith.constant dense<0.000000e+00> : vector<16xf32>
    %105 = vector.multi_reduction <add>, %104, %cst_43 [1] : vector<16x16xf32> to vector<16xf32>
    %106 = vector.shape_cast %105 : vector<16xf32> to vector<16x1xf32>
    %107 = tpu.reciprocal %106 {approx = true} : vector<16x1xf32> -> vector<16x1xf32>
    %108 = vector.broadcast %107 : vector<16x1xf32> to vector<16x16xf32>
    %109 = arith.mulf %104, %108 : vector<16x16xf32>
    %110 = vector.extract_strided_slice %18 {offsets = [0, 16], sizes = [16, 8], strides = [1, 1]} : vector<16x32xf32> to vector<16x8xf32>
    %cst_44 = arith.constant dense<0.000000e+00> : vector<16x8xf32>
    %111 = tpu.matmul %109, %110, %cst_44 {dimension_numbers = #tpu.dot_dimension_numbers<[1], [0], [0], [1], [0, 0, 1, 1], [], []>} : vector<16x16xf32>, vector<16x8xf32>, vector<16x8xf32> -> vector<16x8xf32>
    %c16 = arith.constant 16 : index
    %c0_45 = arith.constant 0 : index
    %112 = vector.load %arg6[%c16, %c0_45] : memref<32x32xf32, #tpu.memory_space<vmem>>, vector<8x32xf32>
    %cst_46 = arith.constant dense<0.000000e+00> : vector<16x32xf32>
    %113 = tpu.matmul %111, %112, %cst_46 {dimension_numbers = #tpu.dot_dimension_numbers<[1], [0], [0], [1], [0, 0, 1, 1], [], []>} : vector<16x8xf32>, vector<8x32xf32>, vector<16x32xf32> -> vector<16x32xf32>
    %114 = arith.addf %94, %113 : vector<16x32xf32>
    %115 = vector.extract_strided_slice %10 {offsets = [0, 24], sizes = [16, 8], strides = [1, 1]} : vector<16x32xf32> to vector<16x8xf32>
    %116 = vector.extract_strided_slice %17 {offsets = [0, 24], sizes = [16, 8], strides = [1, 1]} : vector<16x32xf32> to vector<16x8xf32>
    %cst_47 = arith.constant dense<0.000000e+00> : vector<16x16xf32>
    %117 = tpu.matmul %115, %116, %cst_47 {dimension_numbers = #tpu.dot_dimension_numbers<[1], [1], [0], [0], [0, 0, 1, 0], [], []>} : vector<16x8xf32>, vector<16x8xf32>, vector<16x16xf32> -> vector<16x16xf32>
    %cst_48 = arith.constant -1.000000e+30 : f32
    %118 = vector.broadcast %cst_48 : f32 to vector<16x16xf32>
    %119 = arith.select %53, %117, %118 : vector<16x16xi1>, vector<16x16xf32>
    %cst_49 = arith.constant dense<0xFF800000> : vector<16xf32>
    %120 = vector.multi_reduction <maximumf>, %119, %cst_49 [1] : vector<16x16xf32> to vector<16xf32>
    %121 = vector.shape_cast %120 : vector<16xf32> to vector<16x1xf32>
    %122 = vector.broadcast %121 : vector<16x1xf32> to vector<16x16xf32>
    %123 = arith.subf %119, %122 : vector<16x16xf32>
    %124 = math.exp %123 : vector<16x16xf32>
    %cst_50 = arith.constant dense<0.000000e+00> : vector<16xf32>
    %125 = vector.multi_reduction <add>, %124, %cst_50 [1] : vector<16x16xf32> to vector<16xf32>
    %126 = vector.shape_cast %125 : vector<16xf32> to vector<16x1xf32>
    %127 = tpu.reciprocal %126 {approx = true} : vector<16x1xf32> -> vector<16x1xf32>
    %128 = vector.broadcast %127 : vector<16x1xf32> to vector<16x16xf32>
    %129 = arith.mulf %124, %128 : vector<16x16xf32>
    %130 = vector.extract_strided_slice %18 {offsets = [0, 24], sizes = [16, 8], strides = [1, 1]} : vector<16x32xf32> to vector<16x8xf32>
    %cst_51 = arith.constant dense<0.000000e+00> : vector<16x8xf32>
    %131 = tpu.matmul %129, %130, %cst_51 {dimension_numbers = #tpu.dot_dimension_numbers<[1], [0], [0], [1], [0, 0, 1, 1], [], []>} : vector<16x16xf32>, vector<16x8xf32>, vector<16x8xf32> -> vector<16x8xf32>
    %c24 = arith.constant 24 : index
    %c0_52 = arith.constant 0 : index
    %132 = vector.load %arg6[%c24, %c0_52] : memref<32x32xf32, #tpu.memory_space<vmem>>, vector<8x32xf32>
    %cst_53 = arith.constant dense<0.000000e+00> : vector<16x32xf32>
    %133 = tpu.matmul %131, %132, %cst_53 {dimension_numbers = #tpu.dot_dimension_numbers<[1], [0], [0], [1], [0, 0, 1, 1], [], []>} : vector<16x8xf32>, vector<8x32xf32>, vector<16x32xf32> -> vector<16x32xf32>
    %134 = arith.addf %114, %133 : vector<16x32xf32>
    %c0_54 = arith.constant 0 : index
    %c0_55 = arith.constant 0 : index
    %135 = vector.load %arg1[%c0_54, %c0_55] : memref<16x32xf32, #tpu.memory_space<vmem>>, vector<16x32xf32>
    %136 = vector.broadcast %2 : vector<1x32xf32> to vector<16x32xf32>
    %137 = arith.addf %134, %136 : vector<16x32xf32>
    %138 = vector.broadcast %0 : f32 to vector<16x32xf32>
    %139 = arith.mulf %137, %138 : vector<16x32xf32>
    %140 = arith.addf %135, %139 : vector<16x32xf32>
    %c0_56 = arith.constant 0 : index
    %c0_57 = arith.constant 0 : index
    %141 = vector.load %arg7[%c0_56, %c0_57] : memref<32x64xf32, #tpu.memory_space<vmem>>, vector<32x64xf32>
    %cst_58 = arith.constant dense<0.000000e+00> : vector<16x64xf32>
    %142 = tpu.matmul %140, %141, %cst_58 {dimension_numbers = #tpu.dot_dimension_numbers<[1], [0], [0], [1], [0, 0, 1, 1], [], []>} : vector<16x32xf32>, vector<32x64xf32>, vector<16x64xf32> -> vector<16x64xf32>
    %143 = vector.broadcast %3 : vector<1x64xf32> to vector<16x64xf32>
    %144 = arith.addf %142, %143 : vector<16x64xf32>
    %cst_59 = arith.constant 0.000000e+00 : f32
    %145 = vector.broadcast %cst_59 : f32 to vector<16x64xf32>
    %146 = arith.maximumf %144, %145 : vector<16x64xf32>
    %c0_60 = arith.constant 0 : index
    %c0_61 = arith.constant 0 : index
    %147 = vector.load %arg8[%c0_60, %c0_61] : memref<64x32xf32, #tpu.memory_space<vmem>>, vector<64x32xf32>
    %cst_62 = arith.constant dense<0.000000e+00> : vector<16x32xf32>
    %148 = tpu.matmul %146, %147, %cst_62 {dimension_numbers = #tpu.dot_dimension_numbers<[1], [0], [0], [1], [0, 0, 1, 1], [], []>} : vector<16x64xf32>, vector<64x32xf32>, vector<16x32xf32> -> vector<16x32xf32>
    %149 = vector.broadcast %4 : vector<1x32xf32> to vector<16x32xf32>
    %150 = arith.addf %148, %149 : vector<16x32xf32>
    %151 = vector.broadcast %0 : f32 to vector<16x32xf32>
    %152 = arith.mulf %150, %151 : vector<16x32xf32>
    %153 = arith.addf %140, %152 : vector<16x32xf32>
    %c0_63 = arith.constant 0 : index
    %c0_64 = arith.constant 0 : index
    %154 = vector.load %arg11[%c0_63, %c0_64] : memref<16x32xf32, #tpu.memory_space<vmem>>, vector<16x32xf32>
    tpu.vector_store %arg11[%c0_63, %c0_64], %153 {strides = array<i32>} : memref<16x32xf32, #tpu.memory_space<vmem>>, vector<16x32xf32>,
    return
  }
}

</mosaic_0001>

<bundles_post_ra>
// kernel: tpu_custom_call.1
= control target key start
LH: loop header
LB: loop body
LE: loop exit
PB: predicated region body
PF: predicated region fallthrough
CT: control target
= control target key end

     0   :  { %17 = vsyncpa [#allocation4], 0  ;;  %s2527_s0 = inlined_call_operand.hbm [shape: f32[16,32], index: 0, kind: input, shape index: {}]   ;;  %s2528_s1 = inlined_call_operand.hbm [shape: f32[16,32], index: 1, kind: input, shape index: {}]   ;;  %s2529_s2 = inlined_call_operand.vmem [shape: f32[32,32], index: 2, kind: input, shape index: {}]   ;;  %s2530_s3 = inlined_call_operand.vmem [shape: f32[1,32], index: 3, kind: input, shape index: {}]   ;;  %s2531_s4 = inlined_call_operand.vmem [shape: f32[32,64], index: 4, kind: input, shape index: {}]   ;;  %s2532_s5 = inlined_call_operand.vmem [shape: f32[1,64], index: 5, kind: input, shape index: {}]   ;;  %s2533_s6 = inlined_call_operand.vmem [shape: f32[32,32], index: 6, kind: input, shape index: {}]   ;;  %s2534_s7 = inlined_call_operand.hbm [shape: f32[32,64], index: 7, kind: input, shape index: {}]   ;;  %s2535_s8 = inlined_call_operand.vmem [shape: f32[64,32], index: 8, kind: input, shape index: {}]   ;;  %s2536_s9 = inlined_call_operand.vmem [shape: f32[1,128], index: 9, kind: input, shape index: {}]   ;;  %s2537_s10 = inlined_call_operand.<no memory space> [shape: f32[1], index: 10, kind: input, shape index: {}]   ;;  %s2538_s11 = inlined_call_operand.hbm [shape: f32[16,32], index: 11, kind: output, shape index: {}]  }
   0x1   :  { %18 = vsyncpa [#allocation7], 0 }
   0x2   :  { %19 = vsyncpa [#allocation5], 0  ;;  %s2177_s17 = smov [#allocation6]   ;;  %s2178_s19 = smov [#allocation3]  }
   0x3   :  { %s37_s18 = sshll.u32 %s2177_s17, 4  ;;  %s25_s20 = sshll.u32 %s2178_s19, 4  ;;  %s38_s18 = int_to_ptr.vmem [resolvable:$true] %s37_s18  ;;  %s2251_s20 = int_to_ptr.vmem [resolvable:$true] %s25_s20 }
   0x4   :  { %s2083_s23 = scalar_lea.hbm %s2528_s1, 256 }
   0x5   :  { %p2084_p0 = scmp.ne.s32.totalorder %s2528_s1, %s2083_s23  ;;  %p2087_p1 = scmp.lt.u32.totalorder %s2083_s23, %s2528_s1 }
   0x7   :  { %p2089_p2 = pnand %p2087_p1, %p2084_p0 }
   0x9   :  { %2092 = shalt.err (!%p2089_p2)
}
   0xa   :  { %s2093_s28 = scalar_lea.vmem %s38_s18, 256  ;;  %p2098_p4 = scmp.lt.s32.totalorder %s38_s18, %s38_s18 }
   0xb   :  { %p2094_p3 = scmp.ne.s32.totalorder %s38_s18, %s2093_s28  ;;  %p2099_p5 = scmp.lt.s32.totalorder %s2093_s28, %s2093_s28 }
   0xd   :  { %p2100_p6 = por %p2099_p5, %p2098_p4 }
   0xf   :  { %p2101_p7 = pnand %p2100_p6, %p2094_p3 }
  0x11   :  { %2104 = shalt.err (!%p2101_p7)
}
  0x12   :  { %s2179_s29 = smov 128   ;;  %s2180_s30 = smov 8  }
  0x13   :  { %43 = dma.hbm_to_vmem [thread:$0]  %s2528_s1, 256, %s38_s18, [#allocation7], %s2179_s29, %s2179_s29, %s2180_s30  }
  0x14   :  { %s2105_s16 = scalar_lea.hbm %s2527_s0, 256 }
  0x15   :  { %p2106_p8 = scmp.ne.s32.totalorder %s2527_s0, %s2105_s16  ;;  %p2109_p9 = scmp.lt.u32.totalorder %s2105_s16, %s2527_s0 }
  0x17   :  { %p2111_p10 = pnand %p2109_p9, %p2106_p8 }
  0x19   :  { %2114 = shalt.err (!%p2111_p10)
}
  0x1a   :  { %s2115_s23 = scalar_lea.vmem %s2251_s20, 256  ;;  %p2120_p12 = scmp.lt.s32.totalorder %s2251_s20, %s2251_s20 }
  0x1b   :  { %p2116_p11 = scmp.ne.s32.totalorder %s2251_s20, %s2115_s23  ;;  %p2121_p13 = scmp.lt.s32.totalorder %s2115_s23, %s2115_s23 }
  0x1d   :  { %p2122_p0 = por %p2121_p13, %p2120_p12 }
  0x1f   :  { %p2123_p1 = pnand %p2122_p0, %p2116_p11 }
  0x21   :  { %2126 = shalt.err (!%p2123_p1)
}
  0x22   :  { %31 = dma.hbm_to_vmem [thread:$0]  %s2527_s0, 256, %s2251_s20, [#allocation4], %s2179_s29, %s2179_s29, %s2180_s30  }
  0x23   :  { %s2181_s24 = smov [#allocation8]   ;;  %s2127_s28 = scalar_lea.hbm %s2534_s7, 512 }
  0x24   :  { %s59_s25 = sshll.u32 %s2181_s24, 4  ;;  %p2128_p2 = scmp.ne.s32.totalorder %s2534_s7, %s2127_s28  ;;  %s60_s25 = int_to_ptr.vmem [resolvable:$true] %s59_s25 }
  0x25   :  { %p2131_p3 = scmp.lt.u32.totalorder %s2127_s28, %s2534_s7 }
  0x27   :  { %p2133_p4 = pnand %p2131_p3, %p2128_p2 }
  0x29   :  { %2136 = shalt.err (!%p2133_p4)
}
  0x2a   :  { %s2137_s16 = scalar_lea.vmem %s60_s25, 512  ;;  %p2142_p6 = scmp.lt.s32.totalorder %s60_s25, %s60_s25 }
  0x2b   :  { %p2138_p5 = scmp.ne.s32.totalorder %s60_s25, %s2137_s16  ;;  %p2143_p7 = scmp.lt.s32.totalorder %s2137_s16, %s2137_s16 }
  0x2d   :  { %p2144_p8 = por %p2143_p7, %p2142_p6 }
  0x2f   :  { %p2145_p9 = pnand %p2144_p8, %p2138_p5 }
  0x31   :  { %2148 = shalt.err (!%p2145_p9)
}
  0x32   :  { %65 = dma.hbm_to_vmem [thread:$0]  %s2534_s7, 512, %s60_s25, [#allocation7], %s2179_s29, %s2179_s29, %s2180_s30  }
  0x33   :  { %2171 = dma.done.wait [#allocation4], 256  }
  0x34   :  { %2172 = vsyncadd [#allocation4], 4294967040 }
  0x35   :  { %2173 = dma.done.wait [#allocation7], 768  }
  0x36   :  { %2174 = vsyncadd [#allocation7], 4294966528  ;;  %vm96_vm0 = vcmask 261120   ;;  %v85_v0 = vld [vmem:[%s2529_s2] sm:$0xff]  ;;  %v86_v1 = vld [vmem:[%s2529_s2 + $0x8] sm:$0xff]  ;;  %vm315_vm1 = vcmask 64512   ;;  %v272_v29 = vlaneseq }
  0x37   :  { %v87_v2 = vld [vmem:[%s2529_s2 + $0x10] sm:$0xff]  ;;  %v1916_v3 = vpack.c.bf16 %v86_v1, %v85_v0  ;;  %v88_v4 = vld [vmem:[%s2529_s2 + $0x18] sm:$0xff]  ;;  %v83_v5 = vld [vmem:[#allocation3] sm:$0xff]  ;;  %vm405_vm4 = vcmask 130048   ;;  %s2184_s0 = smov 112   ;;  %s2185_s20 = smov 88  }
  0x38   :  { %v1920_v6 = vpack.c.bf16 %v88_v4, %v87_v2  ;;  %1796 = vmatprep.mubr.msk.f32.mxu1 %vm96_vm0, %v83_v5  ;;  %v180_v7 = vld [vmem:[%s2531_s4] sm:$0xff]  ;;  %v181_v8 = vld [vmem:[%s2531_s4 + $0x8] sm:$0xff]  ;;  %v182_v10 = vld [vmem:[%s2531_s4 + $0x10] sm:$0xff]  ;;  %v273_v30 = vshrl.u32 %v272_v29, 7  ;;  %v276_v31 = vand.u32 127, %v272_v29  ;;  %s2186_s17 = smov 104  }
  0x39   :  { %1917 = vmatprep.subr.bf16.mxu1 %v1916_v3  ;;  %v1924_v9 = vpack.c.bf16 %v181_v8, %v180_v7  ;;  %v183_v11 = vld [vmem:[%s2531_s4 + $0x18] sm:$0xff]  ;;  %v84_v12 = vld [vmem:[#allocation3 + $0x8] sm:$0xff]  ;;  %v2328_v14 = vld [vmem:[#allocation6] sm:$0xff]  ;;  %s2187_s19 = smov 80   ;;  %s2188_s21 = smov 72   ;;  %vm1567_vm6 = vcmask 523264  }
  0x3a   :  { %1919 = vmatpush3.bf16.msra.mxu1 %v1916_v3  ;;  %v1928_v13 = vpack.c.bf16 %v183_v11, %v182_v10  ;;  %v2333_v15 = vld [vmem:[#allocation6 + $0x8] sm:$0xff]  ;;  %v1673_v16 = vld [vmem:[%s2530_s3] ss:$0 sm:$0xff]  ;;  %vm2349_vm2 = vmpackc.low %vm315_vm1, %vm315_vm1  ;;  %s2182_s3 = smov 120   ;;  %v274_v32 = vadd.s32 8, %v273_v30  ;;  %v305_v33 = vand.u32 1, %v276_v31 }
  0x3b   :  { %1921 = vmatprep.subr.bf16.mxu1 %v1920_v6  ;;  %v1676_v20 = vld [vmem:[%s2532_s5] ss:$0 sm:$0xff]  ;;  %v281_v34 = vand.u32 1, %v273_v30  ;;  %s2183_s5 = smov 96  }
  0x3c   :  { %v288_v35 = vand.u32 1, %v274_v32  ;;  %v515_v25 = vld [vmem:[%s2533_s6] sm:$0xff] }
  0x3d   :  { %vm2367_vm3 = vcmp.eq.s32.totalorder %v281_v34, %v305_v33 }
  0x3e   :  { %1923 = vmatpush3.bf16.msra.mxu1 %v1920_v6  ;;  %vm2371_vm5 = vcmp.eq.s32.totalorder %v288_v35, %v305_v33 }
  0x3f   :  { %1925 = vmatprep.subr.bf16.mxu1 %v1924_v9 }
  0x41   :  { %1797 = vmatmul.mubr.msk.f32.vlgmr.msra.gmra.mrb[0].mxu1 %vm96_vm0, %v84_v12 }
  0x42   :  { %1927 = vmatpush3.bf16.msra.mxu1 %v1924_v9  ;;  %1807 = vmatprep.mubr.msk.f32.mxu1 %vm96_vm0, %v2328_v14 }
  0x43   :  { %1929 = vmatprep.subr.bf16.mxu1 %v1928_v13 }
  0x46   :  { %1931 = vmatpush3.bf16.msra.mxu1 %v1928_v13 }
  0x49   :  { %1808 = vmatmul.mubr.msk.f32.vlgmr.msra.gmra.mrb[2].mxu1 %vm96_vm0, %v2333_v15 }
 0x114   :  { %v1798_v17 = vpop.f32.mrb[0].mxu1 }
 0x115   :  { %v169_v18 = vpop.f32.mrb[1].mxu1  ;;  %v2363_v28 = vadd.f32 %v1798_v17, %v1673_v16 }
 0x116   :  { %v2340_v19 = vadd.f32 %v1673_v16, %v169_v18 }
 0x118   :  { %1814 = vmatprep.mubr.msk.f32.mxu0 %vm315_vm1, %v2340_v19 }
 0x11c   :  { %v1809_v21 = vpop.f32.mrb[2].mxu1 }
 0x11d   :  { %v269_v22 = vadd.f32 %v1809_v21, %v1676_v20  ;;  %v263_v23 = vpop.f32.mrb[3].mxu1 }
 0x11e   :  { %v264_v24 = vadd.f32 %v1676_v20, %v263_v23 }
 0x120   :  { %v2353_v26 = vpack.i.bf16 %v269_v22, %v264_v24  ;;  %v1932_v27 = vpack.c.bf16 %v269_v22, %v264_v24 }
 0x122   :  { %2022 = vrot.lane.b32.xlu1 %v2353_v26, %s2182_s3  ;;  %1934 = vmatprep.subr.msk.bf16.mxu0 %vm2349_vm2, %v1932_v27 }
 0x123   :  { %1937 = vmatpush3.bf16.xpose.msk.msra.mxu0 %vm2349_vm2, %v1932_v27 }
 0x126   :  { %516 = vrot.lane.b32.xlu1 %v2340_v19, %s2182_s3 }
 0x12a   :  { %1815 = vmatmul.mubr.msk.f32.vlgmr.msra.gmra.mrb[0].mxu0 %vm315_vm1, %v2363_v28 }
 0x194   :  { %v2023_v47 = vpop.permute.xlu1 %2022 }
 0x195   :  { %v2025_v51 = vunpack.i.h.bf16 %v2023_v47  ;;  %v2024_v53 = vunpack.i.l.bf16 %v2023_v47 }
 0x197   :  { %v1942_v57 = vpack.c.bf16 %v2025_v51, %v2024_v53 }
 0x198   :  { %v517_v62 = vpop.permute.xlu1 %516 }
 0x1fd   :  { %v1816_v37 = vpop.f32.mrb[0].mxu0 }
 0x1fe   :  { %v394_v39 = vpop.f32.mrb[1].mxu0  ;;  %v404_v42 = vsel %vm2371_vm5, %v1816_v37, -1e+30 }
 0x1ff   :  { %v403_v40 = vsel %vm2367_vm3, %v394_v39, -1e+30  ;;  %v409_v43 = vsel %vm405_vm4, %v404_v42, -inf }
 0x200   :  { %v406_v41 = vsel %vm405_vm4, %v403_v40, -inf }
 0x201   :  { %407 = vmax.xlane.f32.xlu0 %v406_v41 }
 0x205   :  { %410 = vmax.xlane.f32.xlu0 %v409_v43 }
 0x21b   :  { %2017 = vrot.lane.b32.xlu0 %v2353_v26, %s2183_s5 }
 0x21f   :  { %2027 = vrot.lane.b32.xlu0 %v2353_v26, %s2184_s0 }
 0x223   :  { %883 = vrot.lane.b32.xlu0 %v2363_v28, %s2184_s0 }
 0x28e   :  { %v408_v44 = vpop.xlane.xlu0 %407 }
 0x28f   :  { %v412_v45 = vsub.f32 %v403_v40, %v408_v44 }
 0x291   :  { %v414_v49 = vmul.f32 1.442695, %v412_v45 }
 0x292   :  { %v411_v46 = vpop.xlane.xlu0 %410 }
 0x293   :  { %v413_v48 = vsub.f32 %v404_v42, %v411_v46 }
 0x295   :  { %v416_v50 = vmul.f32 1.442695, %v413_v48 }
 0x296   :  { %v2018_v52 = vpop.permute.xlu0 %2017 }
 0x297   :  { %2051 = vpow2.f32 %v416_v50  ;;  %v2020_v54 = vunpack.i.h.bf16 %v2018_v52  ;;  %v2019_v55 = vunpack.i.l.bf16 %v2018_v52 }
 0x298   :  { %2053 = vpow2.f32 %v414_v49 }
 0x299   :  { %v1938_v56 = vpack.c.bf16 %v2020_v54, %v2019_v55 }
 0x29a   :  { %v2028_v1 = vpop.permute.xlu0 %2027 }
 0x29b   :  { %1939 = vmatprep.subr.bf16.mxu1 %v1938_v56  ;;  %v2030_v4 = vunpack.i.h.bf16 %v2028_v1  ;;  %v2029_v5 = vunpack.i.l.bf16 %v2028_v1 }
 0x29c   :  { %1941 = vmatpush3.bf16.msra.mxu1 %v1938_v56 }
 0x29d   :  { %1944 = vmatprep.subr.msk.bf16.mxu1 %vm2349_vm2, %v1942_v57  ;;  %v1952_v8 = vpack.c.bf16 %v2030_v4, %v2029_v5 }
 0x29e   :  { %v884_v11 = vpop.permute.xlu0 %883 }
 0x2a1   :  { %v2052_v58 = vpop.eup %2051 }
 0x2a2   :  { %v421_v59 = vsel %vm405_vm4, %v2052_v58, 0.0  ;;  %v2054_v60 = vpop.eup %2053 }
 0x2a3   :  { %422 = vadd.xlane.f32.xlu1 %v421_v59  ;;  %v418_v61 = vsel %vm405_vm4, %v2054_v60, 0.0 }
 0x2a7   :  { %419 = vadd.xlane.f32.xlu1 %v418_v61 }
 0x2b8   :  { %518 = vrot.lane.b32.xlu1 %v2363_v28, %s2182_s3 }
 0x2bc   :  { %881 = vrot.lane.b32.xlu1 %v2340_v19, %s2184_s0 }
 0x330   :  { %v423_v63 = vpop.xlane.xlu1 %422 }
 0x331   :  { %2055 = vrcp.f32 %v423_v63 }
 0x334   :  { %v420_v0 = vpop.xlane.xlu1 %419 }
 0x335   :  { %2057 = vrcp.f32 %v420_v0 }
 0x338   :  { %v519_v9 = vpop.permute.xlu1 %518 }
 0x33b   :  { %v2056_v2 = vpop.eup %2055 }
 0x33c   :  { %v427_v7 = vmul.f32 %v2056_v2, %v2052_v58  ;;  %v882_v10 = vpop.permute.xlu1 %881 }
 0x33f   :  { %v2058_v3 = vpop.eup %2057 }
 0x340   :  { %v426_v6 = vmul.f32 %v2058_v3, %v2054_v60  ;;  %v718_v3 = vld [vmem:[%s2533_s6 + $0x8] sm:$0xff] }
 0x342   :  { %1821 = vmatprep.mubr.msk.f32.mxu1 %vm405_vm4, %v426_v6 }
 0x343   :  { %1822 = vmatmul.mubr.msk.f32.vlgmr.msra.gmra.mrb[4].mxu1 %vm405_vm4, %v427_v7 }
 0x344   :  { %1947 = vmatpush3.bf16.xpose.msk.msra.mxu1 %vm2349_vm2, %v1942_v57  ;;  %1828 = vmatprep.mubr.msk.f32.mxu1 %vm315_vm1, %v517_v62 }
 0x345   :  { %1954 = vmatprep.subr.msk.bf16.mxu1 %vm2349_vm2, %v1952_v8 }
 0x34b   :  { %1829 = vmatmul.mubr.msk.f32.vlgmr.msra.gmra.mrb[6].mxu1 %vm315_vm1, %v519_v9 }
 0x34c   :  { %1957 = vmatpush3.bf16.xpose.msk.msra.mxu1 %vm2349_vm2, %v1952_v8  ;;  %1852 = vmatprep.mubr.msk.f32.mxu1 %vm315_vm1, %v882_v10 }
 0x353   :  { %1853 = vmatmul.mubr.msk.f32.vlgmr.msra.gmra.mrb[8].mxu1 %vm315_vm1, %v884_v11 }
 0x416   :  { %v2404_v12 = vpop.f32.mrb[4].mxu1 }
 0x417   :  { %v2406_v13 = vpop.f32.mrb[5].mxu1 }
 0x41e   :  { %v1830_v16 = vpop.f32.mrb[6].mxu1 }
 0x41f   :  { %v608_v17 = vsel %vm2371_vm5, %v1830_v16, -1e+30  ;;  %v598_v18 = vpop.f32.mrb[7].mxu1 }
 0x420   :  { %v607_v20 = vsel %vm2367_vm3, %v598_v18, -1e+30  ;;  %v612_v21 = vsel %vm405_vm4, %v608_v17, -inf }
 0x421   :  { %613 = vmax.xlane.f32.xlu0 %v612_v21  ;;  %v609_v22 = vsel %vm405_vm4, %v607_v20, -inf }
 0x422   :  { %610 = vmax.xlane.f32.xlu1 %v609_v22 }
 0x426   :  { %v1854_v23 = vpop.f32.mrb[8].mxu1 }
 0x427   :  { %v963_v24 = vpop.f32.mrb[9].mxu1  ;;  %v973_v49 = vsel %vm2371_vm5, %v1854_v23, -1e+30 }
 0x428   :  { %v972_v27 = vsel %vm2367_vm3, %v963_v24, -1e+30  ;;  %v977_v50 = vsel %vm405_vm4, %v973_v49, -inf }
 0x429   :  { %v974_v29 = vsel %vm405_vm4, %v972_v27, -inf }
 0x433   :  { %2032 = vrot.lane.b32.xlu1 %v2353_v26, %s2185_s20 }
 0x437   :  { %1167 = vrot.lane.b32.xlu1 %v2340_v19, %s2186_s17 }
 0x43b   :  { %1169 = vrot.lane.b32.xlu1 %v2363_v28, %s2186_s17 }
 0x45f   :  { %975 = vmax.xlane.f32.xlu1 %v974_v29 }
 0x470   :  { %2042 = vrot.lane.b32.xlu1 %v2353_v26, %s2187_s19 }
 0x474   :  { %2047 = vrot.lane.b32.xlu1 %v2353_v26, %s2188_s21 }
 0x4ae   :  { %v614_v30 = vpop.xlane.xlu0 %613 }
 0x4af   :  { %v616_v31 = vsub.f32 %v608_v17, %v614_v30  ;;  %v611_v32 = vpop.xlane.xlu1 %610 }
 0x4b0   :  { %v615_v33 = vsub.f32 %v607_v20, %v611_v32 }
 0x4b1   :  { %v619_v19 = vmul.f32 1.442695, %v616_v31 }
 0x4b2   :  { %v617_v34 = vmul.f32 1.442695, %v615_v33 }
 0x4b3   :  { %v2033_v35 = vpop.permute.xlu1 %2032 }
 0x4b4   :  { %2059 = vpow2.f32 %v617_v34  ;;  %v2035_v28 = vunpack.i.h.bf16 %v2033_v35  ;;  %v2034_v37 = vunpack.i.l.bf16 %v2033_v35 }
 0x4b5   :  { %2061 = vpow2.f32 %v619_v19 }
 0x4b6   :  { %v1948_v39 = vpack.c.bf16 %v2035_v28, %v2034_v37 }
 0x4b7   :  { %v1168_v40 = vpop.permute.xlu1 %1167 }
 0x4b8   :  { %1949 = vmatprep.subr.bf16.mxu0 %v1948_v39  ;;  %1871 = vmatprep.mubr.msk.f32.mxu1 %vm315_vm1, %v1168_v40 }
 0x4b9   :  { %1951 = vmatpush3.bf16.msra.mxu0 %v1948_v39 }
 0x4ba   :  { %1838 = vmatprep.subr.mxu0 %v718_v3 }
 0x4bb   :  { %v1170_v45 = vpop.permute.xlu1 %1169 }
 0x4be   :  { %v2060_v41 = vpop.eup %2059 }
 0x4bf   :  { %v621_v42 = vsel %vm405_vm4, %v2060_v41, 0.0  ;;  %v2062_v43 = vpop.eup %2061 }
 0x4c0   :  { %622 = vadd.xlane.f32.xlu0 %v621_v42  ;;  %v624_v44 = vsel %vm405_vm4, %v2062_v43, 0.0 }
 0x4c4   :  { %625 = vadd.xlane.f32.xlu0 %v624_v44 }
 0x4da   :  { %2037 = vrot.lane.b32.xlu0 %v2353_v26, %s2186_s17 }
 0x4ec   :  { %v976_v46 = vpop.xlane.xlu1 %975 }
 0x4ed   :  { %v980_v47 = vsub.f32 %v972_v27, %v976_v46 }
 0x4ef   :  { %v982_v48 = vmul.f32 1.442695, %v980_v47 }
 0x4f0   :  { %v2043_v5 = vpop.permute.xlu1 %2042 }
 0x4f1   :  { %2063 = vpow2.f32 %v982_v48  ;;  %v2045_v7 = vunpack.i.h.bf16 %v2043_v5  ;;  %v2044_v8 = vunpack.i.l.bf16 %v2043_v5 }
 0x4f3   :  { %v1958_v11 = vpack.c.bf16 %v2045_v7, %v2044_v8 }
 0x4f4   :  { %v2048_v23 = vpop.permute.xlu1 %2047 }
 0x4f5   :  { %v2050_v30 = vunpack.i.h.bf16 %v2048_v23  ;;  %v2049_v31 = vunpack.i.l.bf16 %v2048_v23 }
 0x4f7   :  { %v1968_v38 = vpack.c.bf16 %v2050_v30, %v2049_v31 }
 0x4f9   :  { %978 = vmax.xlane.f32.xlu0 %v977_v50  ;;  %v1711_v50 = vld [vmem:[%s2536_s9] ss:$0 sm:$0xff] }
 0x4fb   :  { %v2064_v51 = vpop.eup %2063 }
 0x4fc   :  { %v986_v52 = vsel %vm405_vm4, %v2064_v51, 0.0 }
 0x4fd   :  { %987 = vadd.xlane.f32.xlu0 %v986_v52 }
 0x54d   :  { %v623_v53 = vpop.xlane.xlu0 %622 }
 0x54e   :  { %2065 = vrcp.f32 %v623_v53  ;;  %v1466_v53 = vld [vmem:[#allocation8] sm:$0xff] }
 0x551   :  { %v626_v54 = vpop.xlane.xlu0 %625 }
 0x552   :  { %2067 = vrcp.f32 %v626_v54  ;;  %v1467_v54 = vld [vmem:[#allocation8 + $0x8] sm:$0xff] }
 0x555   :  { %v2038_v26 = vpop.permute.xlu0 %2037 }
 0x556   :  { %v2040_v55 = vunpack.i.h.bf16 %v2038_v26  ;;  %v2039_v56 = vunpack.i.l.bf16 %v2038_v26  ;;  %v1972_v26 = vpack.c.bf16 %v1467_v54, %v1466_v53 }
 0x558   :  { %v2066_v57 = vpop.eup %2065  ;;  %v1962_v58 = vpack.c.bf16 %v2040_v55, %v2039_v56  ;;  %v1468_v55 = vld [vmem:[#allocation8 + $0x10] sm:$0xff]  ;;  %v1469_v56 = vld [vmem:[#allocation8 + $0x18] sm:$0xff] }
 0x559   :  { %v629_v59 = vmul.f32 %v2066_v57, %v2060_v41  ;;  %v1976_v57 = vpack.c.bf16 %v1469_v56, %v1468_v55 }
 0x55a   :  { %1964 = vmatprep.subr.msk.bf16.mxu1 %vm2349_vm2, %v1962_v58 }
 0x55b   :  { %1835 = vmatprep.mubr.msk.f32.mxu0 %vm405_vm4, %v629_v59  ;;  %1967 = vmatpush3.bf16.xpose.msk.msra.mxu1 %vm2349_vm2, %v1962_v58  ;;  %v1556_v58 = vld [vmem:[%s2535_s8] sm:$0xff]  ;;  %v1557_v59 = vld [vmem:[%s2535_s8 + $0x8] sm:$0xff] }
 0x55c   :  { %v2068_v60 = vpop.eup %2067  ;;  %1973 = vmatprep.subr.bf16.mxu1 %v1972_v26 }
 0x55d   :  { %v630_v61 = vmul.f32 %v2068_v60, %v2062_v43  ;;  %v1369_v43 = vld [vmem:[%s2533_s6 + $0x18] sm:$0xff]  ;;  %v1558_v60 = vld [vmem:[%s2535_s8 + $0x10] sm:$0xff] }
 0x55f   :  { %1836 = vmatmul.mubr.msk.f32.vlgmr.msra.gmra.mrb[2].mxu0 %vm405_vm4, %v630_v61  ;;  %v1980_v61 = vpack.c.bf16 %v1557_v59, %v1556_v58 }
 0x560   :  { %1839 = vmatpush3.msra.mxu0 %v718_v3 }
 0x561   :  { %1843 = vmatprep.subr.mxu0 %v515_v25 }
 0x562   :  { %1872 = vmatmul.mubr.msk.f32.vlgmr.msra.gmra.mrb[10].mxu1 %vm315_vm1, %v1170_v45 }
 0x563   :  { %1975 = vmatpush3.bf16.msra.mxu1 %v1972_v26 }
 0x564   :  { %1977 = vmatprep.subr.bf16.mxu1 %v1976_v57 }
 0x567   :  { %1979 = vmatpush3.bf16.msra.mxu1 %v1976_v57 }
 0x586   :  { %v979_v62 = vpop.xlane.xlu0 %978 }
 0x587   :  { %v981_v63 = vsub.f32 %v973_v49, %v979_v62  ;;  %v1559_v62 = vld [vmem:[%s2535_s8 + $0x18] sm:$0xff] }
 0x589   :  { %v984_v0 = vmul.f32 1.442695, %v981_v63  ;;  %v1984_v63 = vpack.c.bf16 %v1559_v62, %v1558_v60 }
 0x58a   :  { %v988_v4 = vpop.xlane.xlu0 %987 }
 0x58b   :  { %2069 = vpow2.f32 %v984_v0  ;;  %v1560_v0 = vld [vmem:[%s2535_s8 + $0x20] sm:$0xff] }
 0x58c   :  { %2071 = vrcp.f32 %v988_v4 }
 0x595   :  { %v2070_v1 = vpop.eup %2069 }
 0x596   :  { %v989_v2 = vsel %vm405_vm4, %v2070_v1, 0.0  ;;  %v2072_v21 = vpop.eup %2071 }
 0x597   :  { %990 = vadd.xlane.f32.xlu0 %v989_v2  ;;  %v994_v29 = vmul.f32 %v2072_v21, %v2064_v51 }
 0x624   :  { %v991_v6 = vpop.xlane.xlu0 %990 }
 0x625   :  { %2073 = vrcp.f32 %v991_v6 }
 0x62f   :  { %v2074_v24 = vpop.eup %2073 }
 0x630   :  { %v995_v36 = vmul.f32 %v2074_v24, %v2070_v1  ;;  %v1561_v1 = vld [vmem:[%s2535_s8 + $0x28] sm:$0xff] }
 0x631   :  { %v1988_v2 = vpack.c.bf16 %v1561_v1, %v1560_v0 }
 0x632   :  { %v1837_v9 = vpop.f32.mrb[2].mxu0 }
 0x633   :  { %v709_v10 = vpop.f32.mrb[3].mxu0 }
 0x634   :  { %1840 = vmatprep.mubr.msk.f32.mxu0 %vm315_vm1, %v709_v10 }
 0x635   :  { %1841 = vmatmul.mubr.msk.f32.vlgmr.msra.gmra.mrb[4].mxu0 %vm315_vm1, %v1837_v9  ;;  %v1873_v16 = vpop.f32.mrb[10].mxu1 }
 0x636   :  { %1844 = vmatpush3.msra.mxu0 %v515_v25  ;;  %1845 = vmatprep.mubr.msk.f32.mxu0 %vm315_vm1, %v2406_v13  ;;  %v1249_v17 = vpop.f32.mrb[11].mxu1  ;;  %v1259_v22 = vsel %vm2371_vm5, %v1873_v16, -1e+30  ;;  %v1083_v13 = vld [vmem:[%s2533_s6 + $0x10] sm:$0xff]  ;;  %v1461_v25 = vstv %s2537_s10  ;;  %v1563_v16 = vld [vmem:[%s2535_s8 + $0x38] sm:$0xff]  ;;  %s2189_s10 = smov 32  }
 0x637   :  { %1959 = vmatprep.subr.bf16.mxu0 %v1958_v11  ;;  %v1258_v18 = vsel %vm2367_vm3, %v1249_v17, -1e+30  ;;  %v1263_v27 = vsel %vm405_vm4, %v1259_v22, -inf  ;;  %1564 = vrot.lane.b32.xlu1 %v1711_v50, %s2189_s10 }
 0x638   :  { %v1260_v20 = vsel %vm405_vm4, %v1258_v18, -inf }
 0x639   :  { %1261 = vmax.xlane.f32.xlu0 %v1260_v20 }
 0x63d   :  { %1264 = vmax.xlane.f32.xlu0 %v1263_v27  ;;  %1846 = vmatmul.mubr.msk.f32.vlgmr.msra.gmra.mrb[4].mxu0 %vm315_vm1, %v2404_v12 }
 0x63e   :  { %1961 = vmatpush3.bf16.msra.mxu0 %v1958_v11  ;;  %1859 = vmatprep.mubr.msk.f32.mxu0 %vm405_vm4, %v994_v29  ;;  %v1562_v11 = vld [vmem:[%s2535_s8 + $0x30] sm:$0xff]  ;;  %s2190_s8 = smov [#allocation9]  }
 0x63f   :  { %1862 = vmatprep.subr.mxu0 %v1083_v13  ;;  %v1992_v17 = vpack.c.bf16 %v1563_v16, %v1562_v11  ;;  %s1660_s1 = sshll.u32 %s2190_s8, 4  ;;  %s1661_s1 = int_to_ptr.vmem [resolvable:$true] %s1660_s1 }
 0x640   :  { %s2149_s18 = scalar_lea.vmem %s1661_s1, 256  ;;  %p2154_p11 = scmp.lt.s32.totalorder %s1661_s1, %s1661_s1 }
 0x641   :  { %1860 = vmatmul.mubr.msk.f32.vlgmr.msra.gmra.mrb[6].mxu0 %vm405_vm4, %v995_v36  ;;  %p2150_p10 = scmp.ne.s32.totalorder %s1661_s1, %s2149_s18  ;;  %p2155_p12 = scmp.lt.s32.totalorder %s2149_s18, %s2149_s18 }
 0x642   :  { %1863 = vmatpush3.msra.mxu0 %v1083_v13 }
 0x643   :  { %1969 = vmatprep.subr.bf16.mxu0 %v1968_v38  ;;  %p2156_p13 = por %p2155_p12, %p2154_p11 }
 0x645   :  { %p2157_p0 = pnand %p2156_p13, %p2150_p10 }
 0x6a9   :  { %v1565_v24 = vpop.permute.xlu1 %1564 }
 0x6c6   :  { %v1262_v32 = vpop.xlane.xlu0 %1261 }
 0x6c7   :  { %v1266_v33 = vsub.f32 %v1258_v18, %v1262_v32 }
 0x6c9   :  { %v1268_v19 = vmul.f32 1.442695, %v1266_v33 }
 0x6ca   :  { %v1265_v34 = vpop.xlane.xlu0 %1264 }
 0x6cb   :  { %2075 = vpow2.f32 %v1268_v19  ;;  %v1267_v35 = vsub.f32 %v1259_v22, %v1265_v34 }
 0x6cd   :  { %v1270_v28 = vmul.f32 1.442695, %v1267_v35 }
 0x6cf   :  { %2077 = vpow2.f32 %v1270_v28 }
 0x6d5   :  { %v2076_v37 = vpop.eup %2075 }
 0x6d6   :  { %v1272_v12 = vsel %vm405_vm4, %v2076_v37, 0.0 }
 0x6d7   :  { %1273 = vadd.xlane.f32.xlu0 %v1272_v12 }
 0x6d9   :  { %v2078_v39 = vpop.eup %2077 }
 0x6da   :  { %v1275_v40 = vsel %vm405_vm4, %v2078_v39, 0.0 }
 0x6db   :  { %1276 = vadd.xlane.f32.xlu0 %v1275_v40 }
 0x6f1   :  { %1470 = vrot.lane.b32.xlu0 %v1711_v50, %s2183_s5 }
 0x714   :  { %v1861_v41 = vpop.f32.mrb[6].mxu0 }
 0x715   :  { %v1074_v42 = vpop.f32.mrb[7].mxu0 }
 0x716   :  { %1864 = vmatprep.mubr.msk.f32.mxu0 %vm315_vm1, %v1074_v42 }
 0x717   :  { %1865 = vmatmul.mubr.msk.f32.vlgmr.msra.gmra.mrb[4].mxu0 %vm315_vm1, %v1861_v41 }
 0x718   :  { %1971 = vmatpush3.bf16.msra.mxu0 %v1968_v38 }
 0x719   :  { %1881 = vmatprep.subr.mxu0 %v1369_v43 }
 0x764   :  { %v1274_v44 = vpop.xlane.xlu0 %1273 }
 0x765   :  { %2079 = vrcp.f32 %v1274_v44 }
 0x768   :  { %v1277_v45 = vpop.xlane.xlu0 %1276 }
 0x769   :  { %2081 = vrcp.f32 %v1277_v45 }
 0x76f   :  { %v2080_v46 = vpop.eup %2079 }
 0x770   :  { %v1280_v47 = vmul.f32 %v2080_v46, %v2076_v37 }
 0x772   :  { %1878 = vmatprep.mubr.msk.f32.mxu0 %vm405_vm4, %v1280_v47 }
 0x773   :  { %v2082_v48 = vpop.eup %2081 }
 0x774   :  { %v1281_v49 = vmul.f32 %v2082_v48, %v2078_v39 }
 0x776   :  { %1879 = vmatmul.mubr.msk.f32.vlgmr.msra.gmra.mrb[8].mxu0 %vm405_vm4, %v1281_v49 }
 0x777   :  { %1882 = vmatpush3.msra.mxu0 %v1369_v43 }
 0x778   :  { %1981 = vmatprep.subr.bf16.mxu0 %v1980_v61 }
 0x849   :  { %v1880_v51 = vpop.f32.mrb[8].mxu0 }
 0x84a   :  { %v1360_v52 = vpop.f32.mrb[9].mxu0 }
 0x84b   :  { %1883 = vmatprep.mubr.msk.f32.mxu0 %vm315_vm1, %v1360_v52 }
 0x84c   :  { %1884 = vmatmul.mubr.msk.f32.vlgmr.msra.gmra.mrb[4].mxu0 %vm315_vm1, %v1880_v51 }
 0x84d   :  { %1983 = vmatpush3.bf16.msra.mxu0 %v1980_v61 }
 0x84e   :  { %1985 = vmatprep.subr.bf16.mxu0 %v1984_v63 }
 0x851   :  { %1987 = vmatpush3.bf16.msra.mxu0 %v1984_v63 }
 0x852   :  { %1989 = vmatprep.subr.bf16.mxu0 %v1988_v2 }
 0x855   :  { %1991 = vmatpush3.bf16.msra.mxu0 %v1988_v2 }
 0x856   :  { %1993 = vmatprep.subr.bf16.mxu0 %v1992_v17 }
 0x859   :  { %1995 = vmatpush3.bf16.msra.mxu0 %v1992_v17 }
 0x91f   :  { %v1885_v3 = vpop.f32.mrb[4].mxu0 }
 0x920   :  { %v1460_v4 = vadd.f32 %v1885_v3, %v1711_v50  ;;  %v1442_v5 = vpop.f32.mrb[5].mxu0 }
 0x921   :  { %v1459_v6 = vadd.f32 %v1711_v50, %v1442_v5 }
 0x922   :  { %v1463_v7 = vmul.f32 %v1461_v25, %v1460_v4 }
 0x923   :  { %v1462_v8 = vmul.f32 %v1461_v25, %v1459_v6 }
 0x924   :  { %v1465_v10 = vadd.f32 %v1463_v7, %v2333_v15 }
 0x925   :  { %v1464_v9 = vadd.f32 %v1462_v8, %v2328_v14  ;;  %v1471_v14 = vpop.permute.xlu0 %1470 }
 0x927   :  { %1894 = vmatprep.mubr.msk.f32.mxu1 %vm96_vm0, %v1464_v9 }
 0x928   :  { %1895 = vmatmul.mubr.msk.f32.vlgmr.msra.gmra.mrb[12].mxu1 %vm96_vm0, %v1465_v10 }
 0x9fb   :  { %v1896_v18 = vpop.f32.mrb[12].mxu1 }
 0x9fc   :  { %v1551_v15 = vadd.f32 %v1896_v18, %v1471_v14  ;;  %v1545_v20 = vpop.f32.mrb[13].mxu1 }
 0x9fd   :  { %v1546_v21 = vadd.f32 %v1545_v20, %v1471_v14 }
 0x9fe   :  { %v1555_v23 = vmax.f32 %v1551_v15, 0.0 }
 0x9ff   :  { %v1554_v22 = vmax.f32 %v1546_v21, 0.0 }
 0xa01   :  { %1913 = vmatprep.mubr.msk.f32.mxu0 %vm1567_vm6, %v1554_v22 }
 0xa02   :  { %1914 = vmatmul.mubr.msk.f32.vlgmr.msra.gmra.mrb[10].mxu0 %vm1567_vm6, %v1555_v23 }
 0xad5   :  { %v1915_v27 = vpop.f32.mrb[10].mxu0 }
 0xad6   :  { %v1646_v29 = vadd.f32 %v1915_v27, %v1565_v24  ;;  %v1640_v13 = vpop.f32.mrb[11].mxu0 }
 0xad7   :  { %v1641_v30 = vadd.f32 %v1640_v13, %v1565_v24 }
 0xad8   :  { %v1650_v31 = vmul.f32 %v1646_v29, %v1461_v25 }
 0xad9   :  { %v1649_v36 = vmul.f32 %v1641_v30, %v1461_v25 }
 0xada   :  { %v1652_v38 = vadd.f32 %v1650_v31, %v1465_v10 }
 0xadb   :  { %v1651_v32 = vadd.f32 %v1649_v36, %v1464_v9 }
 0xadc   :  { %1654 = vst.msk [vmem:[#allocation9 + $0x8] sm:$0xff] %vm96_vm0, %v1652_v38 }
 0xadd   :  { %1653 = vst.msk [vmem:[#allocation9] sm:$0xff] %vm96_vm0, %v1651_v32 }
 0xade   :  { %2160 = shalt.err (!%p2157_p0)
}
 0xadf   :  { %s2161_s25 = scalar_lea.hbm %s2538_s11, 256 }
 0xae0   :  { %p2162_p1 = scmp.ne.s32.totalorder %s2538_s11, %s2161_s25  ;;  %p2165_p2 = scmp.lt.u32.totalorder %s2161_s25, %s2538_s11 }
 0xae2   :  { %p2167_p3 = pnand %p2165_p2, %p2162_p1 }
 0xae4   :  { %2170 = shalt.err (!%p2167_p3)
}
 0xae5   :  { %1666 = dma.vmem_to_hbm [thread:$0]  %s1661_s1, 256, %s2538_s11, [#allocation5], %s2179_s29, %s2179_s29, %s2180_s30  }
 0xae6   :  { %2175 = dma.done.wait [#allocation5], 256  }
 0xae7   :  { %2176 = vsyncadd [#allocation5], 4294967040 }
 0xae8   :  { %1670 = vsyncpa [#allocation4], 1 }
 0xae9   :  { %1671 = vsyncpa [#allocation7], 1 }
 0xaea   :  { %1672 = vsyncpa [#allocation5], 1 }

</bundles_post_ra>
